<compile_context>
chip_gen: v5e
topology: v5e:2x2
jax: 0.10.0
libtpu: 0.0.40
codegen_flags: <defaults>
</compile_context>

<pallas_src>
import functools

import jax
import jax.numpy as jnp
from jax import lax
from jax.experimental import pallas as pl
from jax.experimental.pallas import tpu as pltpu

_LANES = 128
_ACC_ROWS = 32             # 4 independent (8, 128) accumulator tiles
_MAX_BLOCK_ROWS = 8192     # 4 MiB f32 per block (8 MiB double-buffered)
_SMALL_MAX_ELEMS = 512 * 1024
_NUM_CORES = 2             # leading "parallel" grid axis (used on 2-TC chips)


def _round_up(x: int, m: int) -> int:
    return ((x + m - 1) // m) * m


def _small_kernel(p_ref, o_ref, *, inv_n):
    """Single-block path: whole (rows, 128) tile in VMEM, scalar out in SMEM."""
    x = p_ref[...].astype(jnp.float32)
    o_ref[0, 0] = jnp.sum(jnp.log1p(x * x)) * jnp.float32(inv_n)


def _reduce_kernel(p_ref, o_ref, acc_ref, *, valid_rows, blocks_per_core):
    # p_ref  : (block_rows, 128) parameter tile in VMEM (pipelined)
    # o_ref  : (1, 1) f32 partial sum in SMEM, one row per "core" grid index
    # acc_ref: (32, 128) f32 VMEM accumulator (resident across the row axis)
    c = pl.program_id(0)          # parallel axis (TensorCore on v7x)
    i = pl.program_id(1)          # arbitrary (reduction) axis

    @pl.when(i == 0)
    def _():
        acc_ref[...] = jnp.zeros_like(acc_ref)

    block_rows = p_ref.shape[0]
    blk = c * blocks_per_core + i                 # global (unclamped) block id
    row0 = blk * block_rows
    row_ids = row0 + lax.broadcasted_iota(jnp.int32, (block_rows, 1), 0)
    valid = row_ids < valid_rows                  # masks ragged / OOB rows

    x = p_ref[...].astype(jnp.float32)            # free upcast if bf16 input
    x = jnp.where(valid, x, jnp.float32(0.0))     # log1p(0) == 0 contributes 0
    v = jnp.log1p(x * x)                          # VPU mul + EUP log1p

    # Fold (block_rows, 128) -> (32, 128): tile-aligned regroup, 4 independent
    # accumulation chains (no long serial vadd chain), no cross-lane reduce.
    acc_ref[...] += v.reshape(block_rows // _ACC_ROWS, _ACC_ROWS, _LANES).sum(axis=0)

    @pl.when(i == pl.num_programs(1) - 1)
    def _():
        # One XLU reduce per core; scaling by 1/N happens in the wrapper.
        o_ref[0, 0] = jnp.sum(acc_ref[...])


def scale_invariant_objective(param: jax.Array) -> jax.Array:
    """Computes log1p(param**2).mean() with a tiled, pipelined Pallas kernel."""
    n = param.shape[0]
    assert n > 0
    inv_n = 1.0 / n

    p = param
    if p.dtype not in (jnp.float32, jnp.bfloat16):
        p = p.astype(jnp.float32)          # bf16 stays bf16: halves DMA bytes

    # Only pad to 128-lane granularity (<=127 zeros) so the 1-D -> (rows, 128)
    # reshape is a free bitcast; zero padding is exact since log1p(0) == 0.
    rem = n % _LANES
    if rem:
        p = jnp.pad(p, (0, _LANES - rem))
    rows = p.shape[0] // _LANES
    p2d = p.reshape(rows, _LANES)

    if n <= _SMALL_MAX_ELEMS:
        # Fast path: no grid, no scratch, one VMEM tile, one SMEM scalar.
        out = pl.pallas_call(
            functools.partial(_small_kernel, inv_n=inv_n),
            out_shape=jax.ShapeDtypeStruct((1, 1), jnp.float32),
            in_specs=[pl.BlockSpec(memory_space=pltpu.MemorySpace.VMEM)],
            out_specs=pl.BlockSpec(memory_space=pltpu.MemorySpace.SMEM),
        )(p2d)
        return out[0, 0]

    # ---- Large path: streamed, pipelined reduction ----
    # Balanced block size (no whole-block overshoot), rounded to 32 rows so the
    # (.., 32, 128) fold is tile-aligned (also covers bf16's (16,128) packing).
    num_blocks = max(_NUM_CORES, pl.cdiv(rows, _MAX_BLOCK_ROWS))
    block_rows = _round_up(pl.cdiv(rows, num_blocks), _ACC_ROWS)
    num_blocks = pl.cdiv(rows, block_rows)
    blocks_per_core = pl.cdiv(num_blocks, _NUM_CORES)
    last_block = num_blocks - 1

    def in_index(c, i):
        # Clamp so a core's surplus block never issues a fully out-of-bounds
        # DMA; the in-kernel row mask zeroes its contribution anyway.
        return (jnp.minimum(c * blocks_per_core + i, last_block), 0)

    kernel = functools.partial(
        _reduce_kernel, valid_rows=rows, blocks_per_core=blocks_per_core)

    partials = pl.pallas_call(
        kernel,
        out_shape=jax.ShapeDtypeStruct((_NUM_CORES, 1), jnp.float32),
        grid_spec=pltpu.PrefetchScalarGridSpec(
            num_scalar_prefetch=0,
            grid=(_NUM_CORES, blocks_per_core),
            in_specs=[pl.BlockSpec((block_rows, _LANES), in_index)],
            out_specs=pl.BlockSpec((1, 1), lambda c, i: (c, 0),
                                   memory_space=pltpu.MemorySpace.SMEM),
            scratch_shapes=[pltpu.VMEM((_ACC_ROWS, _LANES), jnp.float32)],
        ),
        compiler_params=pltpu.CompilerParams(
            dimension_semantics=("parallel", "arbitrary"),
            vmem_limit_bytes=32 * 1024 * 1024,
        ),
        cost_estimate=pl.CostEstimate(
            flops=3 * n,
            transcendentals=n,
            bytes_accessed=int(p2d.dtype.itemsize) * rows * _LANES + 8,
        ),
    )(p2d)

    return jnp.sum(partials) * jnp.float32(inv_n)


def init_param(size: int = 1024, seed: int = 0) -> jax.Array:
    """Deterministic stand-in for:  logspace(-3, 3, size) * randn(size)."""
    scales = jnp.logspace(-3.0, 3.0, size, dtype=jnp.float32)
    noise = jax.random.normal(jax.random.PRNGKey(seed), (size,), dtype=jnp.float32)
    return scales * noise


if __name__ == "__main__":
    # Module default size (small fast path, one vreg-row tile).
    size = 1024
    param = init_param(size=size, seed=0)
    result = jax.block_until_ready(scale_invariant_objective(param))
    ref = jnp.log1p(jnp.square(param)).mean()
    assert jnp.allclose(result, ref, rtol=1e-5, atol=1e-6), (result, ref)

    # Non-multiple-of-128 size: exercises the <=127-zero padding path.
    p_small = jax.random.normal(jax.random.PRNGKey(0), (2000,), jnp.float32) * 5.0
    r_small = jax.block_until_ready(scale_invariant_objective(p_small))
    ref_small = jnp.log1p(jnp.square(p_small)).mean()
    assert jnp.allclose(r_small, ref_small, rtol=1e-5, atol=1e-6), (r_small, ref_small)

    # Exact block-multiple large size: gridded path, no padding, even core split.
    n_even = _MAX_BLOCK_ROWS * _LANES            # 1,048,576 elements
    p_even = jax.random.normal(jax.random.PRNGKey(0), (n_even,), jnp.float32) * 3.0
    r_even = jax.block_until_ready(scale_invariant_objective(p_even))
    ref_even = jnp.log1p(jnp.square(p_even)).mean()
    assert jnp.allclose(r_even, ref_even, rtol=1e-4, atol=1e-6), (r_even, ref_even)

    # Ragged large size: gridded path + in-kernel row masking + clamped block.
    n_big = 2 * _MAX_BLOCK_ROWS * _LANES + 77
    p_big = jax.random.normal(jax.random.PRNGKey(0), (n_big,), jnp.float32) * 10.0
    r_big = jax.block_until_ready(scale_invariant_objective(p_big))
    ref_big = jnp.log1p(jnp.square(p_big)).mean()
    assert jnp.allclose(r_big, ref_big, rtol=1e-4, atol=1e-6), (r_big, ref_big)

    print("KERNEL_OK")
</pallas_src>

<mosaic_0001>
module attributes {stable_mosaic.version = 11 : i64} {
  func.func @_small_kernel(%arg0: memref<8x128xf32, #tpu.memory_space<vmem>>, %arg1: memref<1x1xf32, #tpu.memory_space<smem>>) attributes {dimension_semantics = [], scalar_prefetch = 0 : i64, scratch_operands = 0 : i64, tpu.core_type = #tpu.core_type<tc>} {
    %c0 = arith.constant 0 : index
    %c0_0 = arith.constant 0 : index
    %0 = vector.load %arg0[%c0, %c0_0] : memref<8x128xf32, #tpu.memory_space<vmem>>, vector<8x128xf32>
    %1 = arith.mulf %0, %0 : vector<8x128xf32>
    %2 = math.log1p %1 : vector<8x128xf32>
    %3 = vector.shape_cast %2 : vector<8x128xf32> to vector<1x8x128xf32>
    %cst = arith.constant dense<0.000000e+00> : vector<1xf32>
    %4 = vector.multi_reduction <add>, %3, %cst [1, 2] : vector<1x8x128xf32> to vector<1xf32>
    %5 = vector.shape_cast %4 : vector<1xf32> to vector<1x1x1xf32>
    %6 = vector.extract %5[0, 0, 0] : f32 from vector<1x1x1xf32>
    %cst_1 = arith.constant 9.765625E-4 : f32
    %7 = arith.mulf %6, %cst_1 : f32
    %c0_2 = arith.constant 0 : index
    %c0_3 = arith.constant 0 : index
    %8 = memref.load %arg1[%c0_2, %c0_3] : memref<1x1xf32, #tpu.memory_space<smem>>
    memref.store %7, %arg1[%c0_2, %c0_3] : memref<1x1xf32, #tpu.memory_space<smem>>
    return
  }
}

</mosaic_0001>

<bundles_post_ra>
// kernel: tpu_custom_call.1
= control target key start
LH: loop header
LB: loop body
LE: loop exit
PB: predicated region body
PF: predicated region fallthrough
CT: control target
= control target key end

     0   :  { %6 = vsyncpa [#allocation3], 0  ;;  %s126_s0 = inlined_call_operand.hbm [shape: f32[8,128], index: 0, kind: input, shape index: {}]   ;;  %s127_s1 = inlined_call_operand.hbm [shape: f32[1,1], index: 1, kind: output, shape index: {}]  }
   0x1   :  { %7 = vsyncpa [#allocation4], 0  ;;  %s13_s8 = sshll.u32 %s126_s0, 4  ;;  %s108_s9 = smov [#allocation2]   ;;  %s14_s8 = int_to_ptr.hbm [resolvable:$true] %s13_s8 }
   0x2   :  { %s15_s10 = sshll.u32 %s108_s9, 4  ;;  %s16_s10 = int_to_ptr.vmem [resolvable:$true] %s15_s10 }
   0x3   :  { %18 = dma.hbm_to_vmem [thread:$0]  %s14_s8, 128, %s16_s10, [#allocation3]  }
   0x4   :  { %104 = dma.done.wait [#allocation3], 128  }
   0x5   :  { %105 = vsyncadd [#allocation3], 4294967168  ;;  %v23_v0 = vld [vmem:[#allocation2] sm:$0xff]  ;;  %s51_s12 = sshll.u32 %s127_s1, 4  ;;  %s109_s15 = smov [#allocation5]   ;;  %s52_s12 = int_to_ptr.hbm [resolvable:$true] %s51_s12 }
   0x6   :  { %v24_v1 = vmul.f32 %v23_v0, %v23_v0 }
   0x8   :  { %v25_v2 = vadd.f32 1.0, %v24_v1  ;;  %v28_v3 = vmul.f32 -0.5, %v24_v1  ;;  %v31_v5 = vand.u32 2147483647, %v24_v1 }
   0xa   :  { %66 = vlog2.f32 %v25_v2  ;;  %v29_v4 = vadd.f32 1.0, %v28_v3  ;;  %vm32_vm0 = vcmp.lt.f32.partialorder %v31_v5, 0.0004427343 }
   0xc   :  { %v30_v6 = vmul.f32 %v29_v4, %v24_v1 }
  0x10   :  { %v67_v7 = vpop.eup %66 }
  0x11   :  { %v27_v8 = vmul.f32 0.6931472, %v67_v7 }
  0x13   :  { %v33_v9 = vsel %vm32_vm0, %v30_v6, %v27_v8 }
  0x14   :  { %34 = vadd.xlane.f32.xlu0 %v33_v9 }
  0x87   :  { %v35_v10 = vpop.xlane.xlu0 %34 }
  0x88   :  { %v36_v11 = vrot.slane %v35_v10, 4 }
  0x8a   :  { %v37_v12 = vadd.f32 %v36_v11, %v35_v10 }
  0x8c   :  { %v38_v13 = vrot.slane %v37_v12, 2 }
  0x8e   :  { %v39_v14 = vadd.f32 %v38_v13, %v37_v12 }
  0x90   :  { %v40_v15 = vrot.slane %v39_v14, 1 }
  0x92   :  { %v41_v16 = vadd.f32 %v40_v15, %v39_v14 }
  0x94   :  { %62 = vpush %v41_v16 }
  0xc5   :  { %s63_s13 = spop %62 }
  0xc6   :  { %s43_s14 = smul.f32 0.0009765625, %s63_s13 }
  0xc8   :  { %45 = sst [smem:[#allocation5]] %s43_s14 }
  0xc9   :  { %54 = dma.smem_to_hbm %s109_s15, 16, %s52_s12, [#allocation4]  }
  0xca   :  { %106 = dma.done.wait [#allocation4], 16  }
  0xcb   :  { %107 = vsyncadd [#allocation4], 4294967280 }
  0xcc   :  { %59 = sfence }
  0xcd   :  { %60 = vsyncpa [#allocation3], 1 }
  0xce   :  { %61 = vsyncpa [#allocation4], 1 }

</bundles_post_ra>
